<compile_context>
chip_gen: v7x
topology: tpu7x:2x2x1
jax: 0.10.0
libtpu: 0.0.40
codegen_flags: <defaults>
</compile_context>

<pallas_src>
import functools

import numpy as np
import jax
import jax.numpy as jnp
from jax.experimental import pallas as pl
from jax.experimental.pallas import tpu as pltpu


# ----------------------------------------------------------------------------
# Pallas kernel
# ----------------------------------------------------------------------------
def make_fsts_kernel(N, tau, inv_bn):
    def kernel(x_ref, f_ref, m_ref, rbd_ref, ibd_ref, rb_ref, ib_ref,
               ur_ref, ui_ref, wbd_ref, cb_ref, out_ref):
        # ---- ortho DFT: re & im in one MXU push ------------------------------
        # f_ref = [cosM; -sinM] (2N, N), x_ref = (N, B*C_in)
        xf = jnp.dot(f_ref[...], x_ref[...],
                     preferred_element_type=jnp.float32)            # (2N, B*C_in)

        # ---- adaptive high-frequency mask (global mean couples the batch) ----
        sq = xf * xf
        en_c = sq[:N, :] + sq[N:, :]                                 # (N, B*C_in)
        # threshold as energy >= tau*(mean+eps)  (no per-element divide)
        thr = tau * (jnp.sum(en_c, keepdims=True) * inv_bn + 1e-6)   # (1, 1)
        # per-(n, b) channel-summed energy broadcast to the C_out lanes of each
        # batch block via one block-ones matmul (no reshapes in-kernel)
        en_b = jnp.dot(en_c, m_ref[...],
                       preferred_element_type=jnp.float32)           # (N, B*C_out)
        mask = (en_b >= thr).astype(jnp.float32)                     # (N, B*C_out)

        # ---- complex linear (block-diag batched): 2 MXU pushes ---------------
        # mask is applied AFTER the matmuls (it commutes with the channel
        # contraction), so no concatenate / masked spectrum copy is needed.
        pr = jnp.dot(xf, rbd_ref[...], preferred_element_type=jnp.float32)  # (2N, B*C_out)
        pi = jnp.dot(xf, ibd_ref[...], preferred_element_type=jnp.float32)  # (2N, B*C_out)
        # relu followed by softshrink(lambd) == max(v - lambd, 0);
        # lambd is already folded into rb_ref / ib_ref wrapper-side.
        o_r = jnp.maximum(mask * (pr[:N, :] - pi[N:, :]) + rb_ref[...], 0.0)
        o_i = jnp.maximum(mask * (pr[N:, :] + pi[:N, :]) + ib_ref[...], 0.0)

        # ---- iFFT + Conv1d taps + positional mean, folded into U_r / U_in ----
        z = (jnp.dot(ur_ref[...], o_r, preferred_element_type=jnp.float32) +
             jnp.dot(ui_ref[...], o_i, preferred_element_type=jnp.float32))  # (P, B*C_out)

        # ---- per-tap channel mixing: single fused VPU contraction ------------
        # out[jo] = cb[jo] + sum_{t, j} z[t, j] * Wbd[t, j, jo]
        prod = z[:, :, None] * wbd_ref[...]                          # (P, BC, BC)
        acc = jnp.sum(prod, axis=0)                                  # (BC, BC)
        out_ref[...] = cb_ref[...] + jnp.sum(acc, axis=0, keepdims=True)  # (1, BC)

    return kernel


# ----------------------------------------------------------------------------
# Static (shape-only) operators — built once per shape, cached on host
# ----------------------------------------------------------------------------
@functools.lru_cache(maxsize=None)
def _static_operators(B, N, C_in, C_out, period):
    P = int(period)
    pad = P // 2
    N_out = N + 2 * pad - P + 1

    idx = np.arange(N)
    ang = 2.0 * np.pi * np.outer(idx, idx) / N
    cosM = np.cos(ang) / np.sqrt(N)
    sinM = np.sin(ang) / np.sqrt(N)
    # ortho DFT, re & im fused into one (2N, N) operator
    Fmat = np.concatenate([cosM, -sinM], axis=0).astype(np.float32)

    # S_bar[t, m] = mean over conv output positions of the one-hot tap select
    # (folds Conv1d padding/taps AND the trailing mean(dim=1))
    S_bar = np.zeros((P, N), np.float32)
    for t in range(P):
        for m in range(N):
            j = m - t + pad
            if 0 <= j < N_out:
                S_bar[t, m] = 1.0 / N_out
    # fold the ortho iFFT (real part) into the same operators (split re/im)
    Ur = (S_bar @ cosM).astype(np.float32)          # (P, N)
    Uin = (-(S_bar @ sinM)).astype(np.float32)      # (P, N)

    # block-ones: per-batch channel-energy sum broadcast to the C_out lanes
    Mblk = np.kron(np.eye(B), np.ones((C_in, C_out))).astype(np.float32)
    return Fmat, Mblk, Ur, Uin


# ----------------------------------------------------------------------------
# Wrapper: parameter re-packing + pallas_call (jit'ed -> packing compiled once)
# ----------------------------------------------------------------------------
@functools.partial(jax.jit, static_argnames=("period", "tau", "lambd"))
def fsts_forward(x, params, *, period, tau, lambd=0.01):
    B, N, C_in = x.shape
    r1, i1, rb1, ib1, W, cb = params
    C_out = r1.shape[1]
    P = int(period)

    Fnp, Mnp, Urnp, Uinp = _static_operators(B, N, C_in, C_out, P)
    Fmat = jnp.asarray(Fnp)
    Mblk = jnp.asarray(Mnp)
    Ur = jnp.asarray(Urnp)
    Uin = jnp.asarray(Uinp)

    # block-diagonal (batched) complex-linear weights
    eyeB = jnp.eye(B, dtype=jnp.float32)
    r1f = r1.astype(jnp.float32)
    i1f = i1.astype(jnp.float32)
    R_bd = jnp.einsum("ab,io->aibo", eyeB, r1f).reshape(B * C_in, B * C_out)
    I_bd = jnp.einsum("ab,io->aibo", eyeB, i1f).reshape(B * C_in, B * C_out)
    # biases tiled over the batch lane blocks, softshrink lambd pre-folded
    rb_adj = jnp.tile(rb1.reshape(1, -1).astype(jnp.float32), (1, B)) - lambd
    ib_adj = jnp.tile(ib1.reshape(1, -1).astype(jnp.float32), (1, B)) - lambd

    # conv weights: wt[t, i, o] = W[o, i, t], block-diagonalized over batch
    wt = jnp.transpose(W.astype(jnp.float32), (2, 1, 0))             # (P, C_out, C_out)
    wt_bd = jnp.einsum("ab,tio->taibo", eyeB, wt).reshape(P, B * C_out, B * C_out)
    cb_bd = jnp.tile(cb.reshape(1, -1).astype(jnp.float32), (1, B))  # (1, B*C_out)

    # channel-last, batch folded into lanes: x_nc[n, b*C_in + c] = x[b, n, c]
    x_nc = jnp.transpose(x, (1, 0, 2)).reshape(N, B * C_in).astype(jnp.float32)

    operands = (x_nc, Fmat, Mblk, R_bd, I_bd, rb_adj, ib_adj, Ur, Uin, wt_bd, cb_bd)
    op_bytes = 4 * (sum(int(np.prod(a.shape)) for a in operands) + B * C_out)
    vmem_limit = int(min(64 * 1024 * 1024, max(8 * 1024 * 1024, 4 * op_bytes)))

    kernel = make_fsts_kernel(N=N, tau=float(tau), inv_bn=1.0 / float(B * N))
    vmem = pl.BlockSpec(memory_space=pltpu.MemorySpace.VMEM)
    out_flat = pl.pallas_call(
        kernel,
        out_shape=jax.ShapeDtypeStruct((1, B * C_out), jnp.float32),
        in_specs=[vmem] * len(operands),
        out_specs=vmem,
        compiler_params=pltpu.CompilerParams(vmem_limit_bytes=vmem_limit),
    )(*operands)

    return out_flat.reshape(B, C_out)


# ----------------------------------------------------------------------------
# Pure-JAX reference (for correctness check)
# ----------------------------------------------------------------------------
def ref_forward(x, r1, i1, rb1, ib1, W, cb, tau, lambd, period):
    P = int(period)
    Xf = jnp.fft.fft(x, axis=1, norm="ortho")
    energy = jnp.sum(jnp.abs(Xf) ** 2, axis=-1)
    mean = jnp.mean(energy)
    mask = (energy / (mean + 1e-6) >= tau).astype(jnp.float32)[..., None]
    lf = Xf * mask
    o_r = (jnp.einsum("bnc,cd->bnd", lf.real, r1)
           - jnp.einsum("bnc,cd->bnd", lf.imag, i1) + rb1.reshape(-1))
    o_i = (jnp.einsum("bnc,cd->bnd", lf.imag, r1)
           + jnp.einsum("bnc,cd->bnd", lf.real, i1) + ib1.reshape(-1))
    o_r = jax.nn.relu(o_r)
    o_i = jax.nn.relu(o_i)
    ss = lambda v: jnp.where(v > lambd, v - lambd,
                             jnp.where(v < -lambd, v + lambd, jnp.zeros_like(v)))
    yf = ss(o_r) + 1j * ss(o_i)
    y = jnp.fft.ifft(yf, axis=1, norm="ortho").real            # (B, N, C_out)
    yc = jnp.transpose(y, (0, 2, 1))                            # NCW
    out = jax.lax.conv_general_dilated(
        yc, W, window_strides=(1,), padding=[(P // 2, P // 2)],
        dimension_numbers=("NCH", "OIH", "NCH"))
    out = out + cb.reshape(1, -1, 1)
    out = jnp.transpose(out, (0, 2, 1))                         # (B, N_out, C_out)
    return jnp.mean(out, axis=1)                                # (B, C_out)


# ----------------------------------------------------------------------------
if __name__ == "__main__":
    B, N = 2, 8
    C_IN, C_OUT = 4, 8
    PERIOD = 3
    TAU = 0.3          # energy_threshold
    LAMBD = 0.01       # sparsity_threshold

    key = jax.random.PRNGKey(0)
    kx, k1, k2, k3, k4, k5, k6 = jax.random.split(key, 7)
    x = jax.random.normal(kx, (B, N, C_IN), dtype=jnp.float32)

    scale = 0.02
    r1 = scale * jax.random.normal(k1, (C_IN, C_OUT), dtype=jnp.float32)
    i1 = scale * jax.random.normal(k2, (C_IN, C_OUT), dtype=jnp.float32)
    rb1 = scale * jax.random.normal(k3, (1, C_OUT), dtype=jnp.float32)
    ib1 = scale * jax.random.normal(k4, (1, C_OUT), dtype=jnp.float32)
    bound = 1.0 / np.sqrt(C_OUT * PERIOD)      # Conv1d-style uniform init
    W = jax.random.uniform(k5, (C_OUT, C_OUT, PERIOD), jnp.float32, -bound, bound)
    cb = jax.random.uniform(k6, (1, C_OUT), jnp.float32, -bound, bound)

    out = fsts_forward(x, (r1, i1, rb1, ib1, W, cb),
                       period=PERIOD, tau=TAU, lambd=LAMBD)
    out = jax.block_until_ready(out)

    ref = jax.block_until_ready(
        ref_forward(x, r1, i1, rb1, ib1, W, cb, TAU, LAMBD, PERIOD))

    assert out.shape == (B, C_OUT), out.shape
    err = np.max(np.abs(np.asarray(out) - np.asarray(ref)))
    assert np.allclose(np.asarray(out), np.asarray(ref), rtol=1e-4, atol=1e-4), f"max err {err}"
    print("KERNEL_OK")
</pallas_src>

<mosaic_0001>
module attributes {stable_mosaic.version = 11 : i64} {
  func.func @kernel(%arg0: memref<8x8xf32, #tpu.memory_space<vmem>>, %arg1: memref<16x8xf32, #tpu.memory_space<vmem>>, %arg2: memref<8x16xf32, #tpu.memory_space<vmem>>, %arg3: memref<8x16xf32, #tpu.memory_space<vmem>>, %arg4: memref<8x16xf32, #tpu.memory_space<vmem>>, %arg5: memref<1x16xf32, #tpu.memory_space<vmem>>, %arg6: memref<1x16xf32, #tpu.memory_space<vmem>>, %arg7: memref<3x8xf32, #tpu.memory_space<vmem>>, %arg8: memref<3x8xf32, #tpu.memory_space<vmem>>, %arg9: memref<3x16x16xf32, #tpu.memory_space<vmem>>, %arg10: memref<1x16xf32, #tpu.memory_space<vmem>>, %arg11: memref<1x16xf32, #tpu.memory_space<vmem>>) attributes {dimension_semantics = [], scalar_prefetch = 0 : i64, scratch_operands = 0 : i64, tpu.core_type = #tpu.core_type<tc>} {
    %c0 = arith.constant 0 : index
    %c0_0 = arith.constant 0 : index
    %0 = vector.load %arg1[%c0, %c0_0] : memref<16x8xf32, #tpu.memory_space<vmem>>, vector<16x8xf32>
    %c0_1 = arith.constant 0 : index
    %c0_2 = arith.constant 0 : index
    %1 = vector.load %arg0[%c0_1, %c0_2] : memref<8x8xf32, #tpu.memory_space<vmem>>, vector<8x8xf32>
    %cst = arith.constant dense<0.000000e+00> : vector<16x8xf32>
    %2 = tpu.matmul %0, %1, %cst {dimension_numbers = #tpu.dot_dimension_numbers<[1], [0], [0], [1], [0, 0, 1, 1], [], []>} : vector<16x8xf32>, vector<8x8xf32>, vector<16x8xf32> -> vector<16x8xf32>
    %3 = arith.mulf %2, %2 : vector<16x8xf32>
    %4 = vector.extract_strided_slice %3 {offsets = [0, 0], sizes = [8, 8], strides = [1, 1]} : vector<16x8xf32> to vector<8x8xf32>
    %5 = vector.extract_strided_slice %3 {offsets = [8, 0], sizes = [8, 8], strides = [1, 1]} : vector<16x8xf32> to vector<8x8xf32>
    %6 = arith.addf %4, %5 : vector<8x8xf32>
    %7 = vector.shape_cast %6 : vector<8x8xf32> to vector<1x8x8xf32>
    %cst_3 = arith.constant dense<0.000000e+00> : vector<1xf32>
    %8 = vector.multi_reduction <add>, %7, %cst_3 [1, 2] : vector<1x8x8xf32> to vector<1xf32>
    %9 = vector.shape_cast %8 : vector<1xf32> to vector<1x1x1xf32>
    %10 = vector.extract %9[0, 0, 0] : f32 from vector<1x1x1xf32>
    %11 = vector.broadcast %10 : f32 to vector<1x1xf32>
    %cst_4 = arith.constant 6.250000e-02 : f32
    %12 = vector.broadcast %cst_4 : f32 to vector<1x1xf32>
    %13 = arith.mulf %11, %12 : vector<1x1xf32>
    %cst_5 = arith.constant 9.99999997E-7 : f32
    %14 = vector.broadcast %cst_5 : f32 to vector<1x1xf32>
    %15 = arith.addf %13, %14 : vector<1x1xf32>
    %cst_6 = arith.constant 3.000000e-01 : f32
    %16 = vector.broadcast %cst_6 : f32 to vector<1x1xf32>
    %17 = arith.mulf %16, %15 : vector<1x1xf32>
    %c0_7 = arith.constant 0 : index
    %c0_8 = arith.constant 0 : index
    %18 = vector.load %arg2[%c0_7, %c0_8] : memref<8x16xf32, #tpu.memory_space<vmem>>, vector<8x16xf32>
    %cst_9 = arith.constant dense<0.000000e+00> : vector<8x16xf32>
    %19 = tpu.matmul %6, %18, %cst_9 {dimension_numbers = #tpu.dot_dimension_numbers<[1], [0], [0], [1], [0, 0, 1, 1], [], []>} : vector<8x8xf32>, vector<8x16xf32>, vector<8x16xf32> -> vector<8x16xf32>
    %20 = vector.broadcast %17 : vector<1x1xf32> to vector<8x16xf32>
    %21 = arith.cmpf oge, %19, %20 : vector<8x16xf32>
    %22 = arith.extui %21 : vector<8x16xi1> to vector<8x16xi32>
    %23 = arith.sitofp %22 : vector<8x16xi32> to vector<8x16xf32>
    %c0_10 = arith.constant 0 : index
    %c0_11 = arith.constant 0 : index
    %24 = vector.load %arg3[%c0_10, %c0_11] : memref<8x16xf32, #tpu.memory_space<vmem>>, vector<8x16xf32>
    %cst_12 = arith.constant dense<0.000000e+00> : vector<16x16xf32>
    %25 = tpu.matmul %2, %24, %cst_12 {dimension_numbers = #tpu.dot_dimension_numbers<[1], [0], [0], [1], [0, 0, 1, 1], [], []>} : vector<16x8xf32>, vector<8x16xf32>, vector<16x16xf32> -> vector<16x16xf32>
    %c0_13 = arith.constant 0 : index
    %c0_14 = arith.constant 0 : index
    %26 = vector.load %arg4[%c0_13, %c0_14] : memref<8x16xf32, #tpu.memory_space<vmem>>, vector<8x16xf32>
    %cst_15 = arith.constant dense<0.000000e+00> : vector<16x16xf32>
    %27 = tpu.matmul %2, %26, %cst_15 {dimension_numbers = #tpu.dot_dimension_numbers<[1], [0], [0], [1], [0, 0, 1, 1], [], []>} : vector<16x8xf32>, vector<8x16xf32>, vector<16x16xf32> -> vector<16x16xf32>
    %28 = vector.extract_strided_slice %25 {offsets = [0, 0], sizes = [8, 16], strides = [1, 1]} : vector<16x16xf32> to vector<8x16xf32>
    %29 = vector.extract_strided_slice %27 {offsets = [8, 0], sizes = [8, 16], strides = [1, 1]} : vector<16x16xf32> to vector<8x16xf32>
    %30 = arith.subf %28, %29 : vector<8x16xf32>
    %31 = arith.mulf %23, %30 : vector<8x16xf32>
    %c0_16 = arith.constant 0 : index
    %c0_17 = arith.constant 0 : index
    %32 = vector.load %arg5[%c0_16, %c0_17] : memref<1x16xf32, #tpu.memory_space<vmem>>, vector<1x16xf32>
    %33 = vector.broadcast %32 : vector<1x16xf32> to vector<8x16xf32>
    %34 = arith.addf %31, %33 : vector<8x16xf32>
    %cst_18 = arith.constant 0.000000e+00 : f32
    %35 = vector.broadcast %cst_18 : f32 to vector<8x16xf32>
    %36 = arith.maximumf %34, %35 : vector<8x16xf32>
    %37 = vector.extract_strided_slice %25 {offsets = [8, 0], sizes = [8, 16], strides = [1, 1]} : vector<16x16xf32> to vector<8x16xf32>
    %38 = vector.extract_strided_slice %27 {offsets = [0, 0], sizes = [8, 16], strides = [1, 1]} : vector<16x16xf32> to vector<8x16xf32>
    %39 = arith.addf %37, %38 : vector<8x16xf32>
    %40 = arith.mulf %23, %39 : vector<8x16xf32>
    %c0_19 = arith.constant 0 : index
    %c0_20 = arith.constant 0 : index
    %41 = vector.load %arg6[%c0_19, %c0_20] : memref<1x16xf32, #tpu.memory_space<vmem>>, vector<1x16xf32>
    %42 = vector.broadcast %41 : vector<1x16xf32> to vector<8x16xf32>
    %43 = arith.addf %40, %42 : vector<8x16xf32>
    %cst_21 = arith.constant 0.000000e+00 : f32
    %44 = vector.broadcast %cst_21 : f32 to vector<8x16xf32>
    %45 = arith.maximumf %43, %44 : vector<8x16xf32>
    %c0_22 = arith.constant 0 : index
    %c0_23 = arith.constant 0 : index
    %46 = vector.load %arg7[%c0_22, %c0_23] : memref<3x8xf32, #tpu.memory_space<vmem>>, vector<3x8xf32>
    %cst_24 = arith.constant dense<0.000000e+00> : vector<3x16xf32>
    %47 = tpu.matmul %46, %36, %cst_24 {dimension_numbers = #tpu.dot_dimension_numbers<[1], [0], [0], [1], [0, 0, 1, 1], [], []>} : vector<3x8xf32>, vector<8x16xf32>, vector<3x16xf32> -> vector<3x16xf32>
    %c0_25 = arith.constant 0 : index
    %c0_26 = arith.constant 0 : index
    %48 = vector.load %arg8[%c0_25, %c0_26] : memref<3x8xf32, #tpu.memory_space<vmem>>, vector<3x8xf32>
    %cst_27 = arith.constant dense<0.000000e+00> : vector<3x16xf32>
    %49 = tpu.matmul %48, %45, %cst_27 {dimension_numbers = #tpu.dot_dimension_numbers<[1], [0], [0], [1], [0, 0, 1, 1], [], []>} : vector<3x8xf32>, vector<8x16xf32>, vector<3x16xf32> -> vector<3x16xf32>
    %50 = arith.addf %47, %49 : vector<3x16xf32>
    %51 = vector.shape_cast %50 : vector<3x16xf32> to vector<3x16x1xf32>
    %c0_28 = arith.constant 0 : index
    %c0_29 = arith.constant 0 : index
    %c0_30 = arith.constant 0 : index
    %52 = vector.load %arg9[%c0_28, %c0_29, %c0_30] : memref<3x16x16xf32, #tpu.memory_space<vmem>>, vector<3x16x16xf32>
    %53 = vector.broadcast %51 : vector<3x16x1xf32> to vector<3x16x16xf32>
    %54 = arith.mulf %53, %52 : vector<3x16x16xf32>
    %cst_31 = arith.constant dense<0.000000e+00> : vector<16x16xf32>
    %55 = vector.multi_reduction <add>, %54, %cst_31 [0] : vector<3x16x16xf32> to vector<16x16xf32>
    %c0_32 = arith.constant 0 : index
    %c0_33 = arith.constant 0 : index
    %56 = vector.load %arg10[%c0_32, %c0_33] : memref<1x16xf32, #tpu.memory_space<vmem>>, vector<1x16xf32>
    %cst_34 = arith.constant dense<0.000000e+00> : vector<16xf32>
    %57 = vector.multi_reduction <add>, %55, %cst_34 [0] : vector<16x16xf32> to vector<16xf32>
    %58 = vector.shape_cast %57 : vector<16xf32> to vector<1x16xf32>
    %59 = arith.addf %56, %58 : vector<1x16xf32>
    %c0_35 = arith.constant 0 : index
    %c0_36 = arith.constant 0 : index
    %60 = vector.load %arg11[%c0_35, %c0_36] : memref<1x16xf32, #tpu.memory_space<vmem>>, vector<1x16xf32>
    tpu.vector_store %arg11[%c0_35, %c0_36], %59 {strides = array<i32>} : memref<1x16xf32, #tpu.memory_space<vmem>>, vector<1x16xf32>,
    return
  }
}

</mosaic_0001>

<bundles_post_ra>
// kernel: fsts_forward.1
= control target key start
LH: loop header
LB: loop body
LE: loop exit
PB: predicated region body
PF: predicated region fallthrough
CT: control target
= control target key end

     0   :  { %vm41_vm0 = vcmask 64512   ;;  %v681_v4 = vmov 0.0   ;;  %vm682_vm1 = vmmov 0   ;;  %v545_v43 = vlaneseq  ;;  %s825_s0 = inlined_call_operand.vmem [shape: f32[8,8], index: 0, kind: input, shape index: {}]   ;;  %s826_s1 = inlined_call_operand.vmem [shape: f32[16,8], index: 1, kind: input, shape index: {}]   ;;  %s827_s3 = inlined_call_operand.vmem [shape: f32[8,16], index: 3, kind: input, shape index: {}]   ;;  %s828_s2 = inlined_call_operand.vmem [shape: f32[8,16], index: 2, kind: input, shape index: {}]   ;;  %s829_s4 = inlined_call_operand.vmem [shape: f32[8,16], index: 4, kind: input, shape index: {}]   ;;  %s830_s5 = inlined_call_operand.vmem [shape: f32[1,16], index: 5, kind: input, shape index: {}]   ;;  %s831_s6 = inlined_call_operand.vmem [shape: f32[1,16], index: 6, kind: input, shape index: {}]   ;;  %s832_s8 = inlined_call_operand.vmem [shape: f32[3,8], index: 8, kind: input, shape index: {}]   ;;  %s833_s7 = inlined_call_operand.vmem [shape: f32[3,8], index: 7, kind: input, shape index: {}]   ;;  %s834_s9 = inlined_call_operand.vmem [shape: f32[3,16,16], index: 9, kind: input, shape index: {}]   ;;  %s835_s10 = inlined_call_operand.vmem [shape: f32[1,16], index: 10, kind: input, shape index: {}]   ;;  %s836_s11 = inlined_call_operand.vmem [shape: f32[1,16], index: 11, kind: output, shape index: {}]  }
   0x1   :  { %v40_v0 = vld [vmem:[%s825_s0] sm:$0xff]  ;;  %v39_v2 = vld [vmem:[%s826_s1 + $0x8] sm:$0xff]  ;;  %v580_v55 = vld [vmem:[%s834_s9 + $0x10] sm:$0xff]  ;;  %vm590_vm3 = vcmask 130048   ;;  %vm612_vm4 = vcmask 122880  }
   0x2   :  { %v38_v1 = vld [vmem:[%s826_s1] sm:$0xff]  ;;  %645 = vmatprep.subr.mxu1 %v40_v0  ;;  %v546_v44 = vshrl.u32 %v545_v43, 7  ;;  %v581_v58 = vld [vmem:[%s834_s9 + $0x18] sm:$0xff]  ;;  %v579_v61 = vld [vmem:[%s834_s9 + $0x8] sm:$0xff] }
   0x3   :  { %647 = vmatprep.mubr.msk.f32.mxu1 %vm41_vm0, %v38_v1  ;;  %646 = vmatpush3.msra.mxu1 %v40_v0  ;;  %v217_v3 = vld [vmem:[%s827_s3] sm:$0xff] }
   0x4   :  { %648 = vmatmul.mubr.msk.f32.vlgmr.msra.gmra.mrb[0].mxu1 %vm41_vm0, %v39_v2  ;;  %655 = vmatprep.subr.mxu0 %v217_v3  ;;  %v140_v5 = vld [vmem:[%s828_s2] sm:$0xff]  ;;  %v547_v45 = vsub.s32 0, %v546_v44  ;;  %v558_v49 = vsub.s32 1, %v546_v44  ;;  %v569_v51 = vsub.s32 2, %v546_v44 }
   0x5   :  { %656 = vmatpush3.msra.mxu0 %v217_v3  ;;  %650 = vmatprep.subr.mxu1 %v681_v4  ;;  %v299_v6 = vld [vmem:[%s829_s4] sm:$0xff] }
   0x6   :  { %665 = vmatprep.subr.mxu0 %v681_v4  ;;  %651 = vmatpush3.msra.mxu1 %v140_v5  ;;  %v626_v34 = vld [vmem:[%s830_s5] ss:$0 sm:$0xff]  ;;  %v583_v5 = vld [vmem:[%s834_s9 + $0x28] sm:$0xff] }
   0x7   :  { %652 = vmatprep.mubr.msk.f32.mxu1 %vm682_vm1, %v681_v4  ;;  %660 = vmatprep.subr.mxu1 %v299_v6  ;;  %v627_v35 = vld [vmem:[%s831_s6] ss:$0 sm:$0xff] }
   0x8   :  { %v398_v40 = vld [vmem:[%s832_s8] sm:$0x7] }
   0x9   :  { %v397_v42 = vld [vmem:[%s833_s7] sm:$0x7] }
   0xa   :  { %v578_v56 = vld [vmem:[%s834_s9] sm:$0xff] }
   0xb   :  { %v582_v62 = vld [vmem:[%s834_s9 + $0x20] sm:$0xff] }
  0xd7   :  { %v649_v7 = vpop.f32.mrb[0].mxu1 }
  0xd8   :  { %v124_v8 = vmul.f32 %v649_v7, %v649_v7  ;;  %v114_v9 = vpop.f32.mrb[1].mxu1 }
  0xd9   :  { %v123_v10 = vmul.f32 %v114_v9, %v114_v9  ;;  %657 = vmatprep.mubr.msk.f32.mxu0 %vm41_vm0, %v114_v9 }
  0xda   :  { %658 = vmatmul.mubr.msk.f32.vlgmr.msra.gmra.mrb[0].mxu0 %vm41_vm0, %v649_v7 }
  0xdb   :  { %v125_v11 = vadd.f32 %v124_v8, %v123_v10  ;;  %667 = vmatprep.mubr.msk.f32.mxu0 %vm682_vm1, %v681_v4 }
  0xdd   :  { %653 = vmatmul.mubr.msk.f32.vlgmr.msra.gmra.mrb[2].mxu1 %vm41_vm0, %v125_v11  ;;  %v126_v12 = vsel %vm41_vm0, %v125_v11, 0.0 }
  0xde   :  { %662 = vmatprep.mubr.msk.f32.mxu1 %vm41_vm0, %v114_v9  ;;  %127 = vadd.xlane.f32.xlu0 %v126_v12 }
  0xdf   :  { %661 = vmatpush3.msra.mxu1 %v299_v6 }
  0xe1   :  { %663 = vmatmul.mubr.msk.f32.vlgmr.msra.gmra.mrb[4].mxu1 %vm41_vm0, %v649_v7 }
 0x16b   :  { %v128_v13 = vpop.xlane.xlu0 %127 }
 0x16c   :  { %v129_v14 = vrot.slane %v128_v13, 4 }
 0x16e   :  { %v130_v15 = vadd.f32 %v129_v14, %v128_v13 }
 0x170   :  { %v131_v16 = vrot.slane %v130_v15, 2 }
 0x172   :  { %v132_v17 = vadd.f32 %v131_v16, %v130_v15 }
 0x174   :  { %v133_v18 = vrot.slane %v132_v17, 1 }
 0x176   :  { %v134_v19 = vadd.f32 %v133_v18, %v132_v17 }
 0x178   :  { %677 = vpush %v134_v19 }
 0x1a9   :  { %s678_s2 = spop %677 }
 0x1aa   :  { %v136_v20 = vstv %s678_s2 }
 0x1ab   :  { %v137_v21 = vmul.f32 0.0625, %v136_v20 }
 0x1ad   :  { %v138_v22 = vadd.f32 1e-06, %v137_v21  ;;  %v659_v23 = vpop.f32.mrb[0].mxu0 }
 0x1ae   :  { %v290_v24 = vpop.f32.mrb[1].mxu0 }
 0x1af   :  { %v139_v25 = vmul.f32 0.3, %v138_v22 }
 0x1b0   :  { %v210_v26 = vpop.f32.mrb[2].mxu1 }
 0x1b1   :  { %v654_v27 = vpop.f32.mrb[3].mxu1  ;;  %vm214_vm2 = vcmp.ge.f32.partialorder %v210_v26, %v139_v25  ;;  %v601_v25 = vld [vmem:[%s835_s10] sm:$0x1] }
 0x1b2   :  { %v621_v31 = vsel %vm214_vm2, 1.0, %v681_v4 }
 0x1b4   :  { %v664_v28 = vpop.f32.mrb[4].mxu1 }
 0x1b5   :  { %v375_v29 = vsub.f32 %v290_v24, %v664_v28  ;;  %v366_v30 = vpop.f32.mrb[5].mxu1 }
 0x1b6   :  { %v386_v32 = vadd.f32 %v659_v23, %v366_v30 }
 0x1b7   :  { %v376_v33 = vmul.f32 %v621_v31, %v375_v29 }
 0x1b8   :  { %v387_v36 = vmul.f32 %v621_v31, %v386_v32 }
 0x1b9   :  { %v384_v37 = vadd.f32 %v626_v34, %v376_v33 }
 0x1ba   :  { %v395_v38 = vadd.f32 %v627_v35, %v387_v36 }
 0x1bb   :  { %v385_v41 = vmax.f32 %v384_v37, 0.0 }
 0x1bc   :  { %v396_v39 = vmax.f32 %v395_v38, 0.0 }
 0x1be   :  { %666 = vmatpush3.msra.mxu0 %v396_v39 }
 0x1bf   :  { %668 = vmatmul.mubr.msk.f32.vlgmr.msra.gmra.mrb[2].mxu0 %vm41_vm0, %v398_v40  ;;  %670 = vmatprep.subr.mxu0 %v681_v4 }
 0x1c0   :  { %671 = vmatpush3.msra.mxu0 %v385_v41  ;;  %672 = vmatprep.mubr.msk.f32.mxu0 %vm682_vm1, %v681_v4 }
 0x1c7   :  { %673 = vmatmul.mubr.msk.f32.vlgmr.msra.gmra.mrb[2].mxu0 %vm41_vm0, %v397_v42 }
 0x29a   :  { %v541_v46 = vpop.f32.mrb[2].mxu0 }
 0x29b   :  { %v674_v47 = vpop.f32.mrb[3].mxu0  ;;  %v548_v48 = vrot.slane %v541_v46, %v547_v45  ;;  %v559_v50 = vrot.slane %v541_v46, %v558_v49  ;;  %v570_v52 = vrot.slane %v541_v46, %v569_v51 }
 0x29d   :  { %554 = vbcast.lane.b32.xlu1 %v548_v48, 264  ;;  %550 = vbcast.lane.b32.xlu0 %v548_v48, 256 }
 0x2a1   :  { %561 = vbcast.lane.b32.xlu1 %v559_v50, 256 }
 0x2a5   :  { %565 = vbcast.lane.b32.xlu1 %v559_v50, 264 }
 0x2a9   :  { %572 = vbcast.lane.b32.xlu1 %v570_v52, 256 }
 0x2ad   :  { %576 = vbcast.lane.b32.xlu1 %v570_v52, 264 }
 0x30f   :  { %v555_v53 = vpop.permute.xlu1 %554  ;;  %v551_v57 = vpop.permute.xlu0 %550 }
 0x310   :  { %v584_v63 = vmul.f32 %v578_v56, %v551_v57  ;;  %v585_v2 = vmul.f32 %v579_v61, %v555_v53 }
 0x312   :  { %v591_v6 = vsel %vm590_vm3, %v584_v63, 0.0  ;;  %v596_v11 = vsel %vm590_vm3, %v585_v2, 0.0 }
 0x313   :  { %v562_v54 = vpop.permute.xlu1 %561 }
 0x314   :  { %v586_v60 = vmul.f32 %v580_v55, %v562_v54 }
 0x316   :  { %v592_v3 = vsel %vm590_vm3, %v586_v60, 0.0 }
 0x317   :  { %v566_v59 = vpop.permute.xlu1 %565  ;;  %v593_v9 = vadd.f32 %v592_v3, %v591_v6 }
 0x318   :  { %v587_v0 = vmul.f32 %v581_v58, %v566_v59 }
 0x31a   :  { %v597_v7 = vsel %vm590_vm3, %v587_v0, 0.0 }
 0x31b   :  { %v573_v1 = vpop.permute.xlu1 %572  ;;  %v598_v13 = vadd.f32 %v597_v7, %v596_v11 }
 0x31c   :  { %v588_v4 = vmul.f32 %v582_v62, %v573_v1 }
 0x31e   :  { %v594_v8 = vsel %vm590_vm3, %v588_v4, 0.0 }
 0x31f   :  { %v577_v10 = vpop.permute.xlu1 %576  ;;  %v595_v14 = vadd.f32 %v594_v8, %v593_v9 }
 0x320   :  { %v589_v12 = vmul.f32 %v583_v5, %v577_v10 }
 0x321   :  { %v602_v17 = vsel %vm590_vm3, %v595_v14, 0.0 }
 0x322   :  { %v599_v15 = vsel %vm590_vm3, %v589_v12, 0.0 }
 0x323   :  { %v600_v16 = vadd.f32 %v599_v15, %v598_v13 }
 0x325   :  { %v603_v18 = vsel %vm590_vm3, %v600_v16, 0.0 }
 0x326   :  { %v604_v19 = vadd.f32 %v603_v18, %v602_v17 }
 0x328   :  { %v605_v20 = vrot.slane %v604_v19, 4 }
 0x32a   :  { %v606_v21 = vadd.f32 %v605_v20, %v604_v19 }
 0x32c   :  { %v607_v22 = vrot.slane %v606_v21, 2 }
 0x32e   :  { %v608_v23 = vadd.f32 %v607_v22, %v606_v21 }
 0x330   :  { %v609_v24 = vrot.slane %v608_v23, 1 }
 0x332   :  { %v610_v26 = vadd.f32 %v609_v24, %v608_v23 }
 0x334   :  { %v611_v27 = vadd.f32 %v610_v26, %v601_v25 }
 0x336   :  { %613 = vst.msk [vmem:[%s836_s11] sm:$0x1] %vm612_vm4, %v611_v27 }

</bundles_post_ra>
